<compile_context>
chip_gen: v7x
topology: tpu7x:2x2x1
jax: 0.10.0
libtpu: 0.0.40
codegen_flags: <defaults>
</compile_context>

<pallas_src>
import jax
import jax.numpy as jnp
from jax.experimental import pallas as pl
from jax.experimental.pallas import tpu as pltpu


def _self_attn_pool_kernel(h_ref, a_ref, bt_ref, o_ref):
    # h_ref : (TB, N, D)  block of input rows
    # a_ref : (D, Da)     projection weight (VMEM-resident across the grid)
    # bt_ref: (1, Da)     scoring vector (the (Da, 1) param, lane-major)
    # o_ref : (TB, D)     pooled output block
    h = h_ref[...].astype(jnp.float32)          # (TB, N, D)
    a = a_ref[...].astype(jnp.float32)          # (D, Da)
    bt = bt_ref[...].astype(jnp.float32)        # (1, Da)

    tb = h.shape[0]

    # t[b] = tanh(h[b] @ a)  -- batched MXU matmul with f32 accumulation.
    a3 = jnp.broadcast_to(a[None, :, :], (tb,) + a.shape)              # (TB, D, Da)
    t = jnp.tanh(
        jnp.einsum(
            "bnd,bde->bne", h, a3,
            preferred_element_type=jnp.float32,
            precision=jax.lax.Precision.HIGHEST,
        )
    )                                                                  # (TB, N, Da)

    # scores e[b, n] = t[b, n, :] . b      (lane reduction over Da)
    e = jnp.sum(t * bt[None, :, :], axis=-1, keepdims=True)            # (TB, N, 1)

    # numerically stable softmax over the sequence axis N
    e = e - jnp.max(e, axis=1, keepdims=True)
    p = jnp.exp(e)
    attn = p / jnp.sum(p, axis=1, keepdims=True)                       # (TB, N, 1)

    # context: attention-weighted sum of the rows of h -> (TB, D)
    ctx = jnp.sum(attn * h, axis=1)
    o_ref[...] = ctx.astype(o_ref.dtype)


def self_attention_layer(h, a, b, *, batch_block=128):
    """Pallas forward pass of SelfAttentionLayer.

    h: (B, N, D) float    a: (D, Da) float    b: (Da, 1) float
    returns: (B, D) float  == torch forward's matmul(attention, h).squeeze(-2)
    """
    B, N, D = h.shape
    Da = a.shape[-1]
    TB = min(batch_block, B)          # batch rows per grid step
    b_row = b.reshape(1, Da)          # lane-major scoring vector

    return pl.pallas_call(
        _self_attn_pool_kernel,
        out_shape=jax.ShapeDtypeStruct((B, D), h.dtype),
        grid_spec=pltpu.PrefetchScalarGridSpec(
            num_scalar_prefetch=0,
            grid=(pl.cdiv(B, TB),),
            in_specs=[
                pl.BlockSpec((TB, N, D), lambda i: (i, 0, 0)),
                pl.BlockSpec((D, Da), lambda i: (0, 0)),
                pl.BlockSpec((1, Da), lambda i: (0, 0)),
            ],
            out_specs=pl.BlockSpec((TB, D), lambda i: (i, 0)),
        ),
        compiler_params=pltpu.CompilerParams(
            dimension_semantics=("parallel",),          # independent batch blocks
            vmem_limit_bytes=32 * 1024 * 1024,          # safe on v5e/v6e/v7x
        ),
    )(h, a, b_row)


def _reference(h, a, b):
    """Pure-JAX mirror of the PyTorch forward (for correctness check)."""
    hp = jax.lax.Precision.HIGHEST
    e = jnp.matmul(jnp.tanh(jnp.matmul(h, a, precision=hp)), b, precision=hp)  # (B, N, 1)
    e = jnp.swapaxes(e, -1, -2)                                                 # (B, 1, N)
    attn = jax.nn.softmax(e, axis=-1)
    return jnp.matmul(attn, h, precision=hp)[..., 0, :]                         # (B, D)


if __name__ == "__main__":
    # Small deterministic shapes consistent with the module.
    batch, seq, dim, da = 2, 8, 32, 16

    key = jax.random.PRNGKey(0)
    kh, ka, kb = jax.random.split(key, 3)

    # Xavier-uniform-like init with gain 1.414 (deterministic, no checkpoint).
    limit_a = 1.414 * (6.0 / (dim + da)) ** 0.5
    limit_b = 1.414 * (6.0 / (da + 1)) ** 0.5
    a = jax.random.uniform(ka, (dim, da), jnp.float32, -limit_a, limit_a)
    b = jax.random.uniform(kb, (da, 1), jnp.float32, -limit_b, limit_b)
    h = jax.random.normal(kh, (batch, seq, dim), dtype=jnp.float32)

    out = self_attention_layer(h, a, b)
    out = jax.block_until_ready(out)

    ref = _reference(h, a, b)
    assert out.shape == (batch, dim), f"bad output shape {out.shape}"
    assert jnp.allclose(out, ref, atol=1e-4, rtol=1e-4), "Pallas SelfAttentionLayer mismatch"

    print("KERNEL_OK")
</pallas_src>

<mosaic_0001>
module attributes {stable_mosaic.version = 11 : i64} {
  func.func @_self_attn_pool_kernel(%arg0: i32, %arg1: memref<2x8x32xf32, #tpu.memory_space<vmem>>, %arg2: memref<32x16xf32, #tpu.memory_space<vmem>>, %arg3: memref<1x16xf32, #tpu.memory_space<vmem>>, %arg4: memref<2x32xf32, #tpu.memory_space<vmem>>) attributes {dimension_semantics = [#tpu.dimension_semantics<parallel>], iteration_bounds = array<i64: 1>, scalar_prefetch = 0 : i64, scratch_operands = 0 : i64, tpu.core_type = #tpu.core_type<tc>, window_params = [{transform_indices = @transform_0, window_bounds = array<i64: 2, 8, 32>}, {pipeline_mode = #tpu.pipeline_mode<synchronous>, transform_indices = @transform_1, window_bounds = array<i64: 32, 16>}, {pipeline_mode = #tpu.pipeline_mode<synchronous>, transform_indices = @transform_2, window_bounds = array<i64: 1, 16>}, {transform_indices = @transform_3, window_bounds = array<i64: 2, 32>}]} {
    %c0 = arith.constant 0 : index
    %c0_0 = arith.constant 0 : index
    %c0_1 = arith.constant 0 : index
    %0 = vector.load %arg1[%c0, %c0_0, %c0_1] : memref<2x8x32xf32, #tpu.memory_space<vmem>>, vector<2x8x32xf32>
    %c0_2 = arith.constant 0 : index
    %c0_3 = arith.constant 0 : index
    %1 = vector.load %arg2[%c0_2, %c0_3] : memref<32x16xf32, #tpu.memory_space<vmem>>, vector<32x16xf32>
    %c0_4 = arith.constant 0 : index
    %c0_5 = arith.constant 0 : index
    %2 = vector.load %arg3[%c0_4, %c0_5] : memref<1x16xf32, #tpu.memory_space<vmem>>, vector<1x16xf32>
    %3 = vector.shape_cast %1 : vector<32x16xf32> to vector<1x32x16xf32>
    %4 = vector.shape_cast %3 : vector<1x32x16xf32> to vector<1x32x16xf32>
    %5 = vector.broadcast %4 : vector<1x32x16xf32> to vector<2x32x16xf32>
    "tpu.trace_start"() <{level = 10 : i32, message = "bnd,bde->bne"}> : () -> ()
    %cst = arith.constant dense<0.000000e+00> : vector<2x8x16xf32>
    %6 = tpu.matmul %0, %5, %cst {dimension_numbers = #tpu.dot_dimension_numbers<[2], [1], [1], [2], [0, 0, 0, 1, 1, 2], [0], [0]>, precision = #tpu.contract_precision<fp32>} : vector<2x8x32xf32>, vector<2x32x16xf32>, vector<2x8x16xf32> -> vector<2x8x16xf32>
    "tpu.trace_stop"() : () -> ()
    %7 = math.tanh %6 : vector<2x8x16xf32>
    %8 = vector.shape_cast %2 : vector<1x16xf32> to vector<1x1x16xf32>
    %9 = vector.broadcast %8 : vector<1x1x16xf32> to vector<2x8x16xf32>
    %10 = arith.mulf %7, %9 : vector<2x8x16xf32>
    %cst_6 = arith.constant dense<0.000000e+00> : vector<2x8xf32>
    %11 = vector.multi_reduction <add>, %10, %cst_6 [2] : vector<2x8x16xf32> to vector<2x8xf32>
    %12 = vector.shape_cast %11 : vector<2x8xf32> to vector<2x8x1xf32>
    %cst_7 = arith.constant dense<0xFF800000> : vector<2x1xf32>
    %13 = vector.multi_reduction <maximumf>, %12, %cst_7 [1] : vector<2x8x1xf32> to vector<2x1xf32>
    %14 = vector.shape_cast %13 : vector<2x1xf32> to vector<2x1x1xf32>
    %15 = vector.broadcast %14 : vector<2x1x1xf32> to vector<2x8x1xf32>
    %16 = arith.subf %12, %15 : vector<2x8x1xf32>
    %17 = math.exp %16 : vector<2x8x1xf32>
    %cst_8 = arith.constant dense<0.000000e+00> : vector<2x1xf32>
    %18 = vector.multi_reduction <add>, %17, %cst_8 [1] : vector<2x8x1xf32> to vector<2x1xf32>
    %19 = vector.shape_cast %18 : vector<2x1xf32> to vector<2x1x1xf32>
    %20 = vector.broadcast %19 : vector<2x1x1xf32> to vector<2x8x1xf32>
    %21 = arith.divf %17, %20 : vector<2x8x1xf32>
    %22 = vector.broadcast %21 : vector<2x8x1xf32> to vector<2x8x32xf32>
    %23 = arith.mulf %22, %0 : vector<2x8x32xf32>
    %cst_9 = arith.constant dense<0.000000e+00> : vector<2x32xf32>
    %24 = vector.multi_reduction <add>, %23, %cst_9 [1] : vector<2x8x32xf32> to vector<2x32xf32>
    %c0_10 = arith.constant 0 : index
    %c0_11 = arith.constant 0 : index
    %25 = vector.load %arg4[%c0_10, %c0_11] : memref<2x32xf32, #tpu.memory_space<vmem>>, vector<2x32xf32>
    tpu.vector_store %arg4[%c0_10, %c0_11], %24 {strides = array<i32>} : memref<2x32xf32, #tpu.memory_space<vmem>>, vector<2x32xf32>,
    return
  }
  func.func @transform_0(%arg0: i32) -> (i32, i32, i32) {
    %c0_i32 = arith.constant 0 : i32
    %c0_i32_0 = arith.constant 0 : i32
    %c0_i32_1 = arith.constant 0 : i32
    return %arg0, %c0_i32, %c0_i32_0 : i32, i32, i32
  }
  func.func @transform_1(%arg0: i32) -> (i32, i32) {
    %c0_i32 = arith.constant 0 : i32
    %c0_i32_0 = arith.constant 0 : i32
    %c0_i32_1 = arith.constant 0 : i32
    return %c0_i32, %c0_i32_0 : i32, i32
  }
  func.func @transform_2(%arg0: i32) -> (i32, i32) {
    %c0_i32 = arith.constant 0 : i32
    %c0_i32_0 = arith.constant 0 : i32
    %c0_i32_1 = arith.constant 0 : i32
    return %c0_i32, %c0_i32_0 : i32, i32
  }
  func.func @transform_3(%arg0: i32) -> (i32, i32) {
    %c0_i32 = arith.constant 0 : i32
    %c0_i32_0 = arith.constant 0 : i32
    return %arg0, %c0_i32 : i32, i32
  }
}

</mosaic_0001>

<bundles_post_ra>
// kernel: tpu_custom_call.1
= control target key start
LH: loop header
LB: loop body
LE: loop exit
PB: predicated region body
PF: predicated region fallthrough
CT: control target
= control target key end

     0   :  { %v1412_v3 = vmov 0.0|0.0   ;;  %vm22_vm0 = vcmask 261120   ;;  %vm1413_vm1 = vmmov 0   ;;  %v1414_v10 = vmov 0.0   ;;  %s1595_s0 = inlined_call_operand.vmem [shape: f32[2,8,32], index: 0, kind: input, shape index: {}]   ;;  %s1596_s1 = inlined_call_operand.vmem [shape: f32[32,16], index: 1, kind: input, shape index: {}]   ;;  %s1597_s2 = inlined_call_operand.vmem [shape: f32[1,16], index: 2, kind: input, shape index: {}]   ;;  %s1598_s3 = inlined_call_operand.hbm [shape: f32[2,32], index: 3, kind: output, shape index: {}]  }
   0x1   :  { %v17_v0 = vld [vmem:[%s1596_s1] sm:$0xff]  ;;  %v18_v1 = vld [vmem:[%s1596_s1 + $0x8] sm:$0xff]  ;;  %v19_v2 = vld [vmem:[%s1596_s1 + $0x10] sm:$0xff]  ;;  %1280 = vmatprep.subr.bf16.mxu0 %v1412_v3  ;;  %1316 = vmatprep.subr.bf16.mxu1 %v1412_v3 }
   0x2   :  { %v27_v4 = vand.u32 4294901760, %v17_v0  ;;  %v30_v5 = vand.u32 4294901760, %v18_v1  ;;  %v20_v6 = vld [vmem:[%s1596_s1 + $0x18] sm:$0xff]  ;;  %v33_v7 = vand.u32 4294901760, %v19_v2  ;;  %v1453_v8 = vld [vmem:[%s1595_s0] sm:$0xff]  ;;  %1156 = vmatprep.mubr.msk.f32.mxu0 %vm1413_vm1, %v1414_v10  ;;  %1222 = vmatprep.mubr.msk.f32.mxu1 %vm1413_vm1, %v1414_v10  ;;  %v1464_v12 = vld [vmem:[%s1595_s0 + $0x8] sm:$0xff] }
   0x3   :  { %v36_v9 = vand.u32 4294901760, %v20_v6  ;;  %v24_v11 = vsel %vm22_vm0, %v1453_v8, 0 }
   0x4   :  { %8 = vsyncpa [#allocation3], 0  ;;  %v1466_v13 = vpack.c.bf16 %v30_v5, %v27_v4  ;;  %v1468_v14 = vand.u32 4294901760, %v24_v11  ;;  %v512_v15 = vsel %vm22_vm0, %v1464_v12, 0  ;;  %v1472_v16 = vsub.f32 %v17_v0, %v27_v4  ;;  %v1087_v52 = vld [vmem:[%s1597_s2] ss:$0 sm:$0xff] }
   0x5   :  { %v1474_v17 = vand.u32 4294901760, %v512_v15  ;;  %v1476_v18 = vsub.f32 %v18_v1, %v30_v5  ;;  %v1478_v19 = vsub.f32 %v19_v2, %v33_v7  ;;  %v1482_v20 = vpack.c.bf16 %v36_v9, %v33_v7  ;;  %s1415_s2 = smov [#allocation2]  }
   0x6   :  { %1282 = vmatpush3.bf16.msra.mxu0 %v1466_v13  ;;  %1318 = vmatpush3.bf16.msra.mxu1 %v1466_v13  ;;  %v1485_v21 = vsub.f32 %v24_v11, %v1468_v14  ;;  %v108_v22 = vand.u32 4294901760, %v1472_v16  ;;  %v1488_v23 = vsub.f32 %v20_v6, %v36_v9  ;;  %vm1009_vm2 = vcmask 130048   ;;  %s1079_s24 = sshll.u32 %s1415_s2, 4  ;;  %s1080_s24 = int_to_ptr.vmem [resolvable:$true] %s1079_s24 }
   0x7   :  { %1283 = vmatprep.subr.bf16.mxu0 %v1412_v3  ;;  %1319 = vmatprep.subr.bf16.mxu1 %v1412_v3  ;;  %v1493_v24 = vsub.f32 %v512_v15, %v1474_v17  ;;  %v115_v25 = vand.u32 4294901760, %v1476_v18  ;;  %v122_v26 = vand.u32 4294901760, %v1478_v19  ;;  %v1293_v44 = vpack.c.bf16 %v1476_v18, %v1472_v16  ;;  %s1388_s25 = scalar_lea.vmem %s1080_s24, 32  ;;  %p1393_p1 = scmp.lt.s32.totalorder %s1080_s24, %s1080_s24 }
   0x8   :  { %v97_v27 = vand.u32 4294901760, %v1485_v21  ;;  %v109_v28 = vsub.f32 %v1472_v16, %v108_v22  ;;  %v129_v29 = vand.u32 4294901760, %v1488_v23  ;;  %v1296_v45 = vpack.c.bf16 %v1488_v23, %v1478_v19  ;;  %p1389_p0 = scmp.ne.s32.totalorder %s1080_s24, %s1388_s25  ;;  %p1394_p2 = scmp.lt.s32.totalorder %s1388_s25, %s1388_s25 }
   0x9   :  { %v585_v30 = vand.u32 4294901760, %v1493_v24  ;;  %v116_v31 = vsub.f32 %v1476_v18, %v115_v25  ;;  %v123_v32 = vsub.f32 %v1478_v19, %v122_v26  ;;  %v1305_v46 = vpack.c.bf16 %v115_v25, %v108_v22 }
   0xa   :  { %1285 = vmatpush3.bf16.msra.mxu0 %v1482_v20  ;;  %1321 = vmatpush3.bf16.msra.mxu1 %v1482_v20  ;;  %v98_v33 = vsub.f32 %v1485_v21, %v97_v27  ;;  %v110_v34 = vand.u32 4294901760, %v109_v28  ;;  %v130_v35 = vsub.f32 %v1488_v23, %v129_v29  ;;  %v1308_v47 = vpack.c.bf16 %v129_v29, %v122_v26  ;;  %p1395_p3 = por %p1394_p2, %p1393_p1 }
   0xb   :  { %1286 = vmatprep.subr.bf16.mxu0 %v1412_v3  ;;  %v586_v36 = vsub.f32 %v1493_v24, %v585_v30  ;;  %1322 = vmatprep.subr.bf16.mxu1 %v1412_v3  ;;  %v117_v37 = vand.u32 4294901760, %v116_v31  ;;  %v124_v38 = vand.u32 4294901760, %v123_v32  ;;  %vm1068_vm3 = vcmask 1041409  }
   0xc   :  { %v99_v39 = vand.u32 4294901760, %v98_v33  ;;  %v131_v40 = vand.u32 4294901760, %v130_v35  ;;  %vm1071_vm4 = vcmask 254976   ;;  %p1396_p4 = pnand %p1395_p3, %p1389_p0 }
   0xd   :  { %v587_v41 = vand.u32 4294901760, %v586_v36  ;;  %v1287_v42 = vpack.c.bf16 %v117_v37, %v110_v34 }
   0xe   :  { %1157 = vmatmul.mubr.f32.vlgmr.msra.gmra.mrb[0].mxu0 %v99_v39  ;;  %v1290_v43 = vpack.c.bf16 %v131_v40, %v124_v38 }
   0xf   :  { %1223 = vmatmul.mubr.f32.vlgmr.msra.gmra.mrb[0].mxu1 %v587_v41  ;;  %1288 = vmatpush3.bf16.msra.mxu0 %v1287_v42 }
  0x10   :  { %1324 = vmatpush3.bf16.msra.mxu1 %v1287_v42  ;;  %1289 = vmatprep.subr.bf16.mxu0 %v1412_v3 }
  0x11   :  { %1325 = vmatprep.subr.bf16.mxu1 %v1412_v3  ;;  %1167 = vmatprep.mubr.msk.f32.mxu0 %vm1413_vm1, %v1414_v10 }
  0x12   :  { %1233 = vmatprep.mubr.msk.f32.mxu1 %vm1413_vm1, %v1414_v10 }
  0x13   :  { %1291 = vmatpush3.bf16.msra.mxu0 %v1290_v43 }
  0x14   :  { %1327 = vmatpush3.bf16.msra.mxu1 %v1290_v43  ;;  %1292 = vmatprep.subr.bf16.mxu0 %v1412_v3 }
  0x15   :  { %1328 = vmatprep.subr.bf16.mxu1 %v1412_v3 }
  0x16   :  { %1168 = vmatmul.mubr.f32.vlgmr.msra.gmra.mrb[0].mxu0 %v1468_v14 }
  0x17   :  { %1234 = vmatmul.mubr.f32.vlgmr.msra.gmra.mrb[0].mxu1 %v1474_v17  ;;  %1294 = vmatpush3.bf16.msra.mxu0 %v1293_v44 }
  0x18   :  { %1330 = vmatpush3.bf16.msra.mxu1 %v1293_v44  ;;  %1295 = vmatprep.subr.bf16.mxu0 %v1412_v3 }
  0x19   :  { %1331 = vmatprep.subr.bf16.mxu1 %v1412_v3  ;;  %1178 = vmatprep.mubr.msk.f32.mxu0 %vm1413_vm1, %v1414_v10 }
  0x1a   :  { %1244 = vmatprep.mubr.msk.f32.mxu1 %vm1413_vm1, %v1414_v10 }
  0x1b   :  { %1297 = vmatpush3.bf16.msra.mxu0 %v1296_v45 }
  0x1c   :  { %1333 = vmatpush3.bf16.msra.mxu1 %v1296_v45  ;;  %1298 = vmatprep.subr.bf16.mxu0 %v1412_v3 }
  0x1d   :  { %1334 = vmatprep.subr.bf16.mxu1 %v1412_v3 }
  0x1e   :  { %1179 = vmatmul.mubr.f32.vlgmr.msra.gmra.mrb[0].mxu0 %v1485_v21 }
  0x1f   :  { %1245 = vmatmul.mubr.f32.vlgmr.msra.gmra.mrb[0].mxu1 %v1493_v24  ;;  %1300 = vmatpush3.bf16.msra.mxu0 %v1466_v13 }
  0x20   :  { %1336 = vmatpush3.bf16.msra.mxu1 %v1466_v13  ;;  %1301 = vmatprep.subr.bf16.mxu0 %v1412_v3 }
  0x21   :  { %1337 = vmatprep.subr.bf16.mxu1 %v1412_v3  ;;  %1189 = vmatprep.mubr.msk.f32.mxu0 %vm1413_vm1, %v1414_v10 }
  0x22   :  { %1255 = vmatprep.mubr.msk.f32.mxu1 %vm1413_vm1, %v1414_v10 }
  0x23   :  { %1303 = vmatpush3.bf16.msra.mxu0 %v1482_v20 }
  0x24   :  { %1339 = vmatpush3.bf16.msra.mxu1 %v1482_v20  ;;  %1304 = vmatprep.subr.bf16.mxu0 %v1412_v3 }
  0x25   :  { %1340 = vmatprep.subr.bf16.mxu1 %v1412_v3 }
  0x26   :  { %1190 = vmatmul.mubr.f32.vlgmr.msra.gmra.mrb[0].mxu0 %v97_v27 }
  0x27   :  { %1256 = vmatmul.mubr.f32.vlgmr.msra.gmra.mrb[0].mxu1 %v585_v30  ;;  %1306 = vmatpush3.bf16.msra.mxu0 %v1305_v46 }
  0x28   :  { %1342 = vmatpush3.bf16.msra.mxu1 %v1305_v46  ;;  %1307 = vmatprep.subr.bf16.mxu0 %v1412_v3 }
  0x29   :  { %1343 = vmatprep.subr.bf16.mxu1 %v1412_v3  ;;  %1200 = vmatprep.mubr.msk.f32.mxu0 %vm1413_vm1, %v1414_v10 }
  0x2a   :  { %1266 = vmatprep.mubr.msk.f32.mxu1 %vm1413_vm1, %v1414_v10 }
  0x2b   :  { %1309 = vmatpush3.bf16.msra.mxu0 %v1308_v47 }
  0x2c   :  { %1345 = vmatpush3.bf16.msra.mxu1 %v1308_v47  ;;  %1310 = vmatprep.subr.bf16.mxu0 %v1412_v3 }
  0x2d   :  { %1346 = vmatprep.subr.bf16.mxu1 %v1412_v3 }
  0x2e   :  { %1201 = vmatmul.mubr.f32.vlgmr.msra.gmra.mrb[0].mxu0 %v1468_v14 }
  0x2f   :  { %1267 = vmatmul.mubr.f32.vlgmr.msra.gmra.mrb[0].mxu1 %v1474_v17  ;;  %1312 = vmatpush3.bf16.msra.mxu0 %v1466_v13 }
  0x30   :  { %1348 = vmatpush3.bf16.msra.mxu1 %v1466_v13  ;;  %1313 = vmatprep.subr.bf16.mxu0 %v1412_v3 }
  0x31   :  { %1349 = vmatprep.subr.bf16.mxu1 %v1412_v3  ;;  %1211 = vmatprep.mubr.msk.f32.mxu0 %vm1413_vm1, %v1414_v10 }
  0x32   :  { %1277 = vmatprep.mubr.msk.f32.mxu1 %vm1413_vm1, %v1414_v10 }
  0x33   :  { %1315 = vmatpush3.bf16.msra.mxu0 %v1482_v20 }
  0x34   :  { %1351 = vmatpush3.bf16.msra.mxu1 %v1482_v20 }
  0x36   :  { %1212 = vmatmul.mubr.f32.vlgmr.msra.gmra.mrb[0].mxu0 %v1468_v14 }
  0x37   :  { %1278 = vmatmul.mubr.f32.vlgmr.msra.gmra.mrb[0].mxu1 %v1474_v17 }
 0x109   :  { %v507_v48 = vpop.f32.mrb[0].mxu0 }
 0x10a   :  { %1376 = vtanh.f32 %v507_v48  ;;  %v995_v49 = vpop.f32.mrb[0].mxu1  ;;  %v1213_v50 = vpop.f32.mrb[1].mxu0 }
 0x10b   :  { %1378 = vtanh.f32 %v995_v49  ;;  %v1279_v51 = vpop.f32.mrb[1].mxu1 }
 0x114   :  { %v1377_v53 = vpop.eup %1376 }
 0x115   :  { %v1379_v54 = vpop.eup %1378  ;;  %v1007_v55 = vmul.f32 %v1377_v53, %v1087_v52 }
 0x116   :  { %v1008_v57 = vmul.f32 %v1379_v54, %v1087_v52 }
 0x117   :  { %v1010_v56 = vsel %vm1009_vm2, %v1007_v55, 0.0 }
 0x118   :  { %1011 = vadd.xlane.f32.xlu0 %v1010_v56  ;;  %v1013_v58 = vsel %vm1009_vm2, %v1008_v57, 0.0 }
 0x11c   :  { %1014 = vadd.xlane.f32.xlu0 %v1013_v58 }
 0x1a5   :  { %v1012_v59 = vpop.xlane.xlu0 %1011 }
 0x1a6   :  { %v1016_v60 = vrot.slane %v1012_v59, 4 }
 0x1a8   :  { %v1017_v61 = vmax.f32 %v1012_v59, %v1016_v60 }
 0x1a9   :  { %v1015_v62 = vpop.xlane.xlu0 %1014 }
 0x1aa   :  { %v1018_v63 = vrot.slane %v1017_v61, 2  ;;  %v1022_v0 = vrot.slane %v1015_v62, 4 }
 0x1ac   :  { %v1019_v1 = vmax.f32 %v1017_v61, %v1018_v63  ;;  %v1023_v2 = vmax.f32 %v1015_v62, %v1022_v0 }
 0x1ae   :  { %v1020_v3 = vrot.slane %v1019_v1, 1  ;;  %v1024_v4 = vrot.slane %v1023_v2, 2 }
 0x1b0   :  { %v1021_v5 = vmax.f32 %v1019_v1, %v1020_v3  ;;  %v1025_v6 = vmax.f32 %v1023_v2, %v1024_v4 }
 0x1b2   :  { %v1028_v7 = vsub.f32 %v1012_v59, %v1021_v5  ;;  %v1026_v9 = vrot.slane %v1025_v6, 1 }
 0x1b4   :  { %v1030_v10 = vmul.f32 1.442695, %v1028_v7  ;;  %v1027_v11 = vmax.f32 %v1025_v6, %v1026_v9 }
 0x1b6   :  { %1380 = vpow2.f32 %v1030_v10  ;;  %v1029_v13 = vsub.f32 %v1015_v62, %v1027_v11 }
 0x1b8   :  { %v1032_v14 = vmul.f32 1.442695, %v1029_v13 }
 0x1ba   :  { %1382 = vpow2.f32 %v1032_v14 }
 0x1c0   :  { %v1381_v15 = vpop.eup %1380 }
 0x1c1   :  { %v1034_v16 = vrot.slane %v1381_v15, 4 }
 0x1c3   :  { %v1035_v17 = vadd.f32 %v1381_v15, %v1034_v16 }
 0x1c4   :  { %v1383_v18 = vpop.eup %1382 }
 0x1c5   :  { %v1036_v19 = vrot.slane %v1035_v17, 2  ;;  %v1040_v20 = vrot.slane %v1383_v18, 4 }
 0x1c7   :  { %v1041_v21 = vadd.f32 %v1383_v18, %v1040_v20  ;;  %v1037_v22 = vadd.f32 %v1036_v19, %v1035_v17 }
 0x1c9   :  { %v1042_v23 = vrot.slane %v1041_v21, 2  ;;  %v1038_v24 = vrot.slane %v1037_v22, 1 }
 0x1cb   :  { %v1043_v25 = vadd.f32 %v1042_v23, %v1041_v21  ;;  %v1039_v26 = vadd.f32 %v1038_v24, %v1037_v22 }
 0x1cd   :  { %v1044_v27 = vrot.slane %v1043_v25, 1  ;;  %1384 = vrcp.f32 %v1039_v26 }
 0x1cf   :  { %v1045_v28 = vadd.f32 %v1044_v27, %v1043_v25 }
 0x1d1   :  { %1386 = vrcp.f32 %v1045_v28 }
 0x1d7   :  { %v1385_v29 = vpop.eup %1384 }
 0x1d8   :  { %v1047_v30 = vmul.f32 %v1385_v29, %v1381_v15 }
 0x1da   :  { %v1050_v31 = vmul.f32 %v1047_v30, %v1453_v8 }
 0x1db   :  { %v1387_v32 = vpop.eup %1386 }
 0x1dc   :  { %v1049_v33 = vmul.f32 %v1387_v32, %v1383_v18  ;;  %v1052_v34 = vsel %vm22_vm0, %v1050_v31, 0.0 }
 0x1dd   :  { %v1053_v35 = vrot.slane %v1052_v34, 4 }
 0x1de   :  { %v1051_v36 = vmul.f32 %v1049_v33, %v1464_v12 }
 0x1df   :  { %v1054_v37 = vadd.f32 %v1053_v35, %v1052_v34 }
 0x1e0   :  { %v1059_v38 = vsel %vm22_vm0, %v1051_v36, 0.0 }
 0x1e1   :  { %v1055_v39 = vrot.slane %v1054_v37, 2  ;;  %v1060_v40 = vrot.slane %v1059_v38, 4 }
 0x1e3   :  { %v1056_v41 = vadd.f32 %v1055_v39, %v1054_v37  ;;  %v1061_v42 = vadd.f32 %v1060_v40, %v1059_v38 }
 0x1e5   :  { %v1062_v43 = vrot.slane %v1061_v42, 2  ;;  %v1057_v44 = vrot.slane %v1056_v41, 1 }
 0x1e7   :  { %v1063_v45 = vadd.f32 %v1062_v43, %v1061_v42  ;;  %v1058_v8 = vadd.f32 %v1057_v44, %v1056_v41 }
 0x1e9   :  { %v1064_v46 = vrot.slane %v1063_v45, 1 }
 0x1eb   :  { %v1065_v47 = vadd.f32 %v1064_v46, %v1063_v45 }
 0x1ed   :  { %v1069_v48 = vsel %vm1068_vm3, %v1065_v47, %v1058_v8 }
 0x1ee   :  { %1072 = vst.msk [vmem:[#allocation2] sm:$0x3] %vm1071_vm4, %v1069_v48 }
 0x1ef   :  { %1399 = shalt.err (!%p1396_p4)
}
 0x1f0   :  { %s1400_s28 = scalar_lea.hbm %s1598_s3, 32 }
 0x1f1   :  { %p1401_p5 = scmp.ne.s32.totalorder %s1598_s3, %s1400_s28  ;;  %p1404_p6 = scmp.lt.u32.totalorder %s1400_s28, %s1598_s3 }
 0x1f3   :  { %p1406_p7 = pnand %p1404_p6, %p1401_p5 }
 0x1f5   :  { %1409 = shalt.err (!%p1406_p7)
}
 0x1f6   :  { %1082 = dma.vmem_to_hbm [thread:$0]  %s1080_s24, 32, %s1598_s3, [#allocation3]  }
 0x1f7   :  { %1410 = dma.done.wait [#allocation3], 32  }
 0x1f8   :  { %1411 = vsyncadd [#allocation3], 4294967264 }
 0x1f9   :  { %1086 = vsyncpa [#allocation3], 1 }

</bundles_post_ra>
